<compile_context>
chip_gen: v7x
topology: tpu7x:2x2x1
jax: 0.10.0
libtpu: 0.0.40
codegen_flags: <defaults>
</compile_context>

<pallas_src>
import functools

import jax
import jax.numpy as jnp
from jax import lax
from jax.experimental import pallas as pl
from jax.experimental.pallas import tpu as pltpu


def _round_up(n, m):
    return ((n + m - 1) // m) * m


def qnet_kernel(x_ref, w1_ref, b1_ref, w2_ref, b2_ref, w3_ref, b3_ref, out_ref):
    """One batch tile per grid step.  Activations are feature-major: (features, tb)."""
    x = x_ref[...].astype(jnp.bfloat16)                                    # (tb, S)
    # h1^T = w1 @ x^T : contract fc1 fan-in (S) with x's feature axis -> (H1, tb).
    h1 = lax.dot_general(w1_ref[...], x, (((1,), (1,)), ((), ())),
                         preferred_element_type=jnp.float32)
    h1 = jnp.maximum(h1 + b1_ref[...], 0.0).astype(jnp.bfloat16)           # (H1, tb)
    h2 = jnp.dot(w2_ref[...], h1, preferred_element_type=jnp.float32)      # (H2, tb)
    h2 = jnp.maximum(h2 + b2_ref[...], 0.0).astype(jnp.bfloat16)
    # fc3: (Ap, H2) @ (H2, tb) -> lane-dense (Ap, tb) store (Ap = action_size -> 8).
    out_ref[...] = (jnp.dot(w3_ref[...], h2, preferred_element_type=jnp.float32)
                    + b3_ref[...])


@functools.partial(jax.jit, static_argnames=("tile_b",))
def qnetwork_forward(x, params, tile_b=8192):
    """x: (B, state_size) f32.  params: PyTorch-layout (out, in) weights, (out,) biases."""
    w1, b1, w2, b2, w3, b3 = (params[k] for k in ("w1", "b1", "w2", "b2", "w3", "b3"))
    B, S = x.shape
    H1, H2, A = w1.shape[0], w2.shape[0], w3.shape[0]
    Ap = _round_up(A, 8)                     # fc3 rows padded to 8 sublanes only

    # bf16 MXU operands; biases stay f32, shaped (features, 1) for lane broadcast.
    w1b = w1.astype(jnp.bfloat16)
    w2b = w2.astype(jnp.bfloat16)
    w3p = jnp.zeros((Ap, H2), jnp.bfloat16).at[:A].set(w3.astype(jnp.bfloat16))
    b1c = b1.reshape(H1, 1)
    b2c = b2.reshape(H2, 1)
    b3p = jnp.zeros((Ap, 1), jnp.float32).at[:A, 0].set(b3)

    # Batch tile: single block for small batches, otherwise a lane-aligned tile.
    tb = B if B <= tile_b else _round_up(tile_b, 128)
    grid = (pl.cdiv(B, tb),)                 # ragged final tile; no jnp.pad copy of x

    flops = 2 * B * (S * H1 + H1 * H2 + H2 * Ap)
    bytes_accessed = (4 * B * S + 4 * Ap * B                 # x read + out^T write
                      + 2 * (w1b.size + w2b.size + w3p.size)
                      + 4 * (H1 + H2 + Ap))

    const = lambda i: (0, 0)                 # weights/biases resident in VMEM

    out_t = pl.pallas_call(
        qnet_kernel,
        out_shape=jax.ShapeDtypeStruct((Ap, B), jnp.float32),   # feature-major output
        grid_spec=pltpu.PrefetchScalarGridSpec(
            num_scalar_prefetch=0,
            grid=grid,
            in_specs=[
                pl.BlockSpec((tb, S), lambda i: (i, 0)),        # x: tiled over batch
                pl.BlockSpec((H1, S), const),
                pl.BlockSpec((H1, 1), const),
                pl.BlockSpec((H2, H1), const),
                pl.BlockSpec((H2, 1), const),
                pl.BlockSpec((Ap, H2), const),
                pl.BlockSpec((Ap, 1), const),
            ],
            out_specs=pl.BlockSpec((Ap, tb), lambda i: (0, i)),
        ),
        compiler_params=pltpu.CompilerParams(
            dimension_semantics=("parallel",),
        ),
        cost_estimate=pl.CostEstimate(
            flops=flops, transcendentals=0, bytes_accessed=bytes_accessed),
    )(x, w1b, b1c, w2b, b2c, w3p, b3p)

    # Tiny (A, B) -> (B, A) slice + transpose outside the kernel.
    return out_t[:A, :].T


def init_params(key, state_size, action_size, hidden_a=32, hidden_b=64):
    """Deterministic init mimicking nn.Linear's U(-1/sqrt(fan_in), 1/sqrt(fan_in))."""
    ks = jax.random.split(key, 6)

    def linear(kw, kb, fan_in, fan_out):
        bound = 1.0 / jnp.sqrt(jnp.float32(fan_in))
        # PyTorch layout: weight (out, in), bias (out,)
        w = jax.random.uniform(kw, (fan_out, fan_in), jnp.float32, -bound, bound)
        b = jax.random.uniform(kb, (fan_out,), jnp.float32, -bound, bound)
        return w, b

    w1, b1 = linear(ks[0], ks[1], state_size, hidden_a)
    w2, b2 = linear(ks[2], ks[3], hidden_a, hidden_b)
    w3, b3 = linear(ks[4], ks[5], hidden_b, action_size)
    return {"w1": w1, "b1": b1, "w2": w2, "b2": b2, "w3": w3, "b3": b3}


def qnetwork_ref(x, p):
    """Pure f32 reference (original module semantics)."""
    h1 = jnp.maximum(x @ p["w1"].T + p["b1"], 0.0)
    h2 = jnp.maximum(h1 @ p["w2"].T + p["b2"], 0.0)
    return h2 @ p["w3"].T + p["b3"]


def qnetwork_ref_bf16(x, p):
    """Reference that mirrors the kernel's bf16 operand casts (f32 accumulation)."""
    bf = lambda a: a.astype(jnp.bfloat16).astype(jnp.float32)
    w1, w2, w3 = bf(p["w1"]), bf(p["w2"]), bf(p["w3"])
    h1 = bf(jnp.maximum(bf(x) @ w1.T + p["b1"], 0.0))
    h2 = bf(jnp.maximum(h1 @ w2.T + p["b2"], 0.0))
    return h2 @ w3.T + p["b3"]


if __name__ == "__main__":
    state_size = 8
    action_size = 4

    key = jax.random.PRNGKey(0)
    kp, kx1, kx2 = jax.random.split(key, 3)
    params = init_params(kp, state_size, action_size)

    # Small batch (per-step action selection): single block, shapes equal full dims.
    x_small = jax.random.normal(kx1, (8, state_size), jnp.float32)
    out_small = jax.block_until_ready(qnetwork_forward(x_small, params))
    assert out_small.shape == (8, action_size)
    assert jnp.allclose(out_small, qnetwork_ref_bf16(x_small, params), atol=1e-3, rtol=1e-3)
    assert jnp.allclose(out_small, qnetwork_ref(x_small, params), atol=5e-2, rtol=5e-2)

    # Batch that is not a multiple of the tile: exercises the multi-step batch grid
    # and the ragged (masked) final tile without any padding copy of x.
    x_big = jax.random.normal(kx2, (300, state_size), jnp.float32)
    out_big = jax.block_until_ready(qnetwork_forward(x_big, params, tile_b=256))
    assert out_big.shape == (300, action_size)
    assert jnp.allclose(out_big, qnetwork_ref_bf16(x_big, params), atol=1e-3, rtol=1e-3)
    assert jnp.allclose(out_big, qnetwork_ref(x_big, params), atol=5e-2, rtol=5e-2)

    print("KERNEL_OK")
</pallas_src>

<mosaic_0001>
module attributes {stable_mosaic.version = 11 : i64} {
  func.func @qnet_kernel(%arg0: i32, %arg1: memref<8x8xf32, #tpu.memory_space<vmem>>, %arg2: memref<32x8xbf16, #tpu.memory_space<vmem>>, %arg3: memref<32x1xf32, #tpu.memory_space<vmem>>, %arg4: memref<64x32xbf16, #tpu.memory_space<vmem>>, %arg5: memref<64x1xf32, #tpu.memory_space<vmem>>, %arg6: memref<8x64xbf16, #tpu.memory_space<vmem>>, %arg7: memref<8x1xf32, #tpu.memory_space<vmem>>, %arg8: memref<8x8xf32, #tpu.memory_space<vmem>>) attributes {dimension_semantics = [#tpu.dimension_semantics<parallel>], iteration_bounds = array<i64: 1>, scalar_prefetch = 0 : i64, scratch_operands = 0 : i64, tpu.core_type = #tpu.core_type<tc>, window_params = [{transform_indices = @transform_0, window_bounds = array<i64: 8, 8>}, {pipeline_mode = #tpu.pipeline_mode<synchronous>, transform_indices = @transform_1, window_bounds = array<i64: 32, 8>}, {pipeline_mode = #tpu.pipeline_mode<synchronous>, transform_indices = @transform_2, window_bounds = array<i64: 32, 1>}, {pipeline_mode = #tpu.pipeline_mode<synchronous>, transform_indices = @transform_3, window_bounds = array<i64: 64, 32>}, {pipeline_mode = #tpu.pipeline_mode<synchronous>, transform_indices = @transform_4, window_bounds = array<i64: 64, 1>}, {pipeline_mode = #tpu.pipeline_mode<synchronous>, transform_indices = @transform_5, window_bounds = array<i64: 8, 64>}, {pipeline_mode = #tpu.pipeline_mode<synchronous>, transform_indices = @transform_6, window_bounds = array<i64: 8, 1>}, {transform_indices = @transform_7, window_bounds = array<i64: 8, 8>}]} {
    %c0 = arith.constant 0 : index
    %c0_0 = arith.constant 0 : index
    %0 = vector.load %arg1[%c0, %c0_0] : memref<8x8xf32, #tpu.memory_space<vmem>>, vector<8x8xf32>
    %1 = arith.truncf %0 : vector<8x8xf32> to vector<8x8xbf16>
    %c0_1 = arith.constant 0 : index
    %c0_2 = arith.constant 0 : index
    %2 = vector.load %arg2[%c0_1, %c0_2] : memref<32x8xbf16, #tpu.memory_space<vmem>>, vector<32x8xbf16>
    %cst = arith.constant dense<0.000000e+00> : vector<32x8xf32>
    %3 = tpu.matmul %2, %1, %cst {dimension_numbers = #tpu.dot_dimension_numbers<[1], [1], [0], [0], [0, 0, 1, 0], [], []>} : vector<32x8xbf16>, vector<8x8xbf16>, vector<32x8xf32> -> vector<32x8xf32>
    %c0_3 = arith.constant 0 : index
    %c0_4 = arith.constant 0 : index
    %4 = vector.load %arg3[%c0_3, %c0_4] : memref<32x1xf32, #tpu.memory_space<vmem>>, vector<32x1xf32>
    %5 = vector.broadcast %4 : vector<32x1xf32> to vector<32x8xf32>
    %6 = arith.addf %3, %5 : vector<32x8xf32>
    %cst_5 = arith.constant 0.000000e+00 : f32
    %7 = vector.broadcast %cst_5 : f32 to vector<32x8xf32>
    %8 = arith.maximumf %6, %7 : vector<32x8xf32>
    %9 = arith.truncf %8 : vector<32x8xf32> to vector<32x8xbf16>
    %c0_6 = arith.constant 0 : index
    %c0_7 = arith.constant 0 : index
    %10 = vector.load %arg4[%c0_6, %c0_7] : memref<64x32xbf16, #tpu.memory_space<vmem>>, vector<64x32xbf16>
    %cst_8 = arith.constant dense<0.000000e+00> : vector<64x8xf32>
    %11 = tpu.matmul %10, %9, %cst_8 {dimension_numbers = #tpu.dot_dimension_numbers<[1], [0], [0], [1], [0, 0, 1, 1], [], []>} : vector<64x32xbf16>, vector<32x8xbf16>, vector<64x8xf32> -> vector<64x8xf32>
    %c0_9 = arith.constant 0 : index
    %c0_10 = arith.constant 0 : index
    %12 = vector.load %arg5[%c0_9, %c0_10] : memref<64x1xf32, #tpu.memory_space<vmem>>, vector<64x1xf32>
    %13 = vector.broadcast %12 : vector<64x1xf32> to vector<64x8xf32>
    %14 = arith.addf %11, %13 : vector<64x8xf32>
    %cst_11 = arith.constant 0.000000e+00 : f32
    %15 = vector.broadcast %cst_11 : f32 to vector<64x8xf32>
    %16 = arith.maximumf %14, %15 : vector<64x8xf32>
    %17 = arith.truncf %16 : vector<64x8xf32> to vector<64x8xbf16>
    %c0_12 = arith.constant 0 : index
    %c0_13 = arith.constant 0 : index
    %18 = vector.load %arg6[%c0_12, %c0_13] : memref<8x64xbf16, #tpu.memory_space<vmem>>, vector<8x64xbf16>
    %cst_14 = arith.constant dense<0.000000e+00> : vector<8x8xf32>
    %19 = tpu.matmul %18, %17, %cst_14 {dimension_numbers = #tpu.dot_dimension_numbers<[1], [0], [0], [1], [0, 0, 1, 1], [], []>} : vector<8x64xbf16>, vector<64x8xbf16>, vector<8x8xf32> -> vector<8x8xf32>
    %c0_15 = arith.constant 0 : index
    %c0_16 = arith.constant 0 : index
    %20 = vector.load %arg7[%c0_15, %c0_16] : memref<8x1xf32, #tpu.memory_space<vmem>>, vector<8x1xf32>
    %21 = vector.broadcast %20 : vector<8x1xf32> to vector<8x8xf32>
    %22 = arith.addf %19, %21 : vector<8x8xf32>
    %c0_17 = arith.constant 0 : index
    %c0_18 = arith.constant 0 : index
    %23 = vector.load %arg8[%c0_17, %c0_18] : memref<8x8xf32, #tpu.memory_space<vmem>>, vector<8x8xf32>
    tpu.vector_store %arg8[%c0_17, %c0_18], %22 {strides = array<i32>} : memref<8x8xf32, #tpu.memory_space<vmem>>, vector<8x8xf32>,
    return
  }
  func.func @transform_0(%arg0: i32) -> (i32, i32) {
    %c0_i32 = arith.constant 0 : i32
    %c0_i32_0 = arith.constant 0 : i32
    return %arg0, %c0_i32 : i32, i32
  }
  func.func @transform_1(%arg0: i32) -> (i32, i32) {
    %c0_i32 = arith.constant 0 : i32
    %c0_i32_0 = arith.constant 0 : i32
    %c0_i32_1 = arith.constant 0 : i32
    return %c0_i32, %c0_i32_0 : i32, i32
  }
  func.func @transform_2(%arg0: i32) -> (i32, i32) {
    %c0_i32 = arith.constant 0 : i32
    %c0_i32_0 = arith.constant 0 : i32
    %c0_i32_1 = arith.constant 0 : i32
    return %c0_i32, %c0_i32_0 : i32, i32
  }
  func.func @transform_3(%arg0: i32) -> (i32, i32) {
    %c0_i32 = arith.constant 0 : i32
    %c0_i32_0 = arith.constant 0 : i32
    %c0_i32_1 = arith.constant 0 : i32
    return %c0_i32, %c0_i32_0 : i32, i32
  }
  func.func @transform_4(%arg0: i32) -> (i32, i32) {
    %c0_i32 = arith.constant 0 : i32
    %c0_i32_0 = arith.constant 0 : i32
    %c0_i32_1 = arith.constant 0 : i32
    return %c0_i32, %c0_i32_0 : i32, i32
  }
  func.func @transform_5(%arg0: i32) -> (i32, i32) {
    %c0_i32 = arith.constant 0 : i32
    %c0_i32_0 = arith.constant 0 : i32
    %c0_i32_1 = arith.constant 0 : i32
    return %c0_i32, %c0_i32_0 : i32, i32
  }
  func.func @transform_6(%arg0: i32) -> (i32, i32) {
    %c0_i32 = arith.constant 0 : i32
    %c0_i32_0 = arith.constant 0 : i32
    %c0_i32_1 = arith.constant 0 : i32
    return %c0_i32, %c0_i32_0 : i32, i32
  }
  func.func @transform_7(%arg0: i32) -> (i32, i32) {
    %c0_i32 = arith.constant 0 : i32
    %c0_i32_0 = arith.constant 0 : i32
    return %c0_i32, %arg0 : i32, i32
  }
}

</mosaic_0001>

<bundles_post_ra>
// kernel: qnetwork_forward.1
= control target key start
LH: loop header
LB: loop body
LE: loop exit
PB: predicated region body
PF: predicated region fallthrough
CT: control target
= control target key end

     0   :  { %vm67_vm0 = vcmask 64512   ;;  %v423_v1 = vmov 0   ;;  %vm208_vm1 = vcmask 261120   ;;  %v424_v41 = vmov 0.0   ;;  %s541_s0 = inlined_call_operand.vmem [shape: f32[8,8], index: 0, kind: input, shape index: {}]   ;;  %s542_s1 = inlined_call_operand.vmem [shape: bf16[32,8], index: 1, kind: input, shape index: {}]   ;;  %s543_s2 = inlined_call_operand.vmem [shape: f32[32,1], index: 2, kind: input, shape index: {}]   ;;  %s544_s4 = inlined_call_operand.vmem [shape: f32[64,1], index: 4, kind: input, shape index: {}]   ;;  %s545_s6 = inlined_call_operand.vmem [shape: f32[8,1], index: 6, kind: input, shape index: {}]   ;;  %s546_s3 = inlined_call_operand.vmem [shape: bf16[64,32], index: 3, kind: input, shape index: {}]   ;;  %s547_s5 = inlined_call_operand.vmem [shape: bf16[8,64], index: 5, kind: input, shape index: {}]   ;;  %s548_s7 = inlined_call_operand.vmem [shape: f32[8,8], index: 7, kind: output, shape index: {}]  }
   0x1   :  { %v27_v0 = vld [vmem:[%s541_s0] sm:$0xff]  ;;  %415 = vset.pattern.permute.xlu0 %v423_v1  ;;  %416 = vset.pattern.permute.xlu1 %v423_v1  ;;  %v35_v6 = vld [vmem:[%s543_s2 + $0x10] sm:$0xff]  ;;  %v34_v7 = vld [vmem:[%s543_s2 + $0x8] sm:$0xff]  ;;  %vm425_vm2 = vmmov 0   ;;  %vm305_vm3 = vcmask 523264  }
   0x2   :  { %v28_v2 = vpack.c.bf16 %v27_v0, %v27_v0  ;;  %v417_v3 = vld [vmem:[%s542_s1] sm:$0xff]   ;;  %49 = vperm.xlu1 %416, %v35_v6   ;;  %v36_v8 = vld [vmem:[%s543_s2 + $0x18] sm:$0xff]  ;;  %v418_v9 = vld [vmem:[%s542_s1 + $0x8] sm:$0xff]  }
   0x3   :  { %v33_v4 = vld [vmem:[%s543_s2] sm:$0xff]  ;;  %383 = vmatprep.mubr.msk.bf16.mxu0 %vm67_vm0, %v417_v3  ;;  %v141_v11 = vld [vmem:[%s544_s4 + $0x8] sm:$0xff]  ;;  %v142_v12 = vld [vmem:[%s544_s4 + $0x10] sm:$0xff] }
   0x4   :  { %411 = vmatprep.subr.msk.bf16.mxu0 %vm67_vm0, %v28_v2  ;;  %v75_v5 = vsel %vm67_vm0, %v28_v2, 0  ;;  %39 = vperm.xlu0 %415, %v33_v4   ;;  %v140_v10 = vld [vmem:[%s544_s4] sm:$0xff]  ;;  %v143_v13 = vld [vmem:[%s544_s4 + $0x18] sm:$0xff]  ;;  %v145_v15 = vld [vmem:[%s544_s4 + $0x28] sm:$0xff] }
   0x5   :  { %382 = vmatpush3.bf16.xpose.msra.mxu0 %v75_v5  ;;  %v144_v14 = vld [vmem:[%s544_s4 + $0x20] sm:$0xff]  ;;  %v146_v16 = vld [vmem:[%s544_s4 + $0x30] sm:$0xff]  ;;  %v147_v17 = vld [vmem:[%s544_s4 + $0x38] sm:$0xff] }
   0x6   :  { %54 = vperm.xlu1 %416, %v36_v8   ;;  %v299_v18 = vld [vmem:[%s545_s6] sm:$0xff]  ;;  %v420_v38 = vld [vmem:[%s546_s3 + $0x8] sm:$0xff]   ;;  %v421_v39 = vld [vmem:[%s546_s3 + $0x10] sm:$0xff]   ;;  %399 = vmatprep.subr.bf16.mxu0 %v424_v41 }
   0x7   :  { %v419_v19 = vld [vmem:[%s546_s3] sm:$0xff]   ;;  %v422_v40 = vld [vmem:[%s546_s3 + $0x18] sm:$0xff]  }
   0x8   :  { %44 = vperm.xlu0 %415, %v34_v7   ;;  %391 = vmatprep.mubr.msk.bf16.mxu1 %vm208_vm1, %v419_v19 }
   0xa   :  { %155 = vperm.xlu1 %416, %v141_v11  }
   0xc   :  { %384 = vmatmul.mubr.msk.bf16.vlgmr.msra.gmra.mrb[0].mxu0 %vm67_vm0, %v418_v9  ;;  %150 = vperm.xlu0 %415, %v140_v10  }
   0xd   :  { %407 = vmatprep.mubr.msk.bf16.mxu0 %vm425_vm2, %v424_v41 }
   0xe   :  { %165 = vperm.xlu1 %416, %v143_v13  }
  0x10   :  { %160 = vperm.xlu0 %415, %v142_v12  }
  0x12   :  { %175 = vperm.xlu1 %416, %v145_v15  }
  0x14   :  { %170 = vperm.xlu0 %415, %v144_v14   ;;  %v298_v14 = vld [vmem:[%s547_s5] sm:$0xf] }
  0x16   :  { %185 = vperm.xlu1 %416, %v147_v17  }
  0x18   :  { %180 = vperm.xlu0 %415, %v146_v16  }
  0x1c   :  { %302 = vperm.xlu0 %415, %v299_v18  }
  0x81   :  { %v50_v20 = vpop.permute.xlu1 %49 }
  0x83   :  { %v40_v21 = vpop.permute.xlu0 %39 }
  0x85   :  { %v55_v25 = vpop.permute.xlu1 %54 }
  0x87   :  { %v45_v28 = vpop.permute.xlu0 %44 }
  0x89   :  { %v156_v43 = vpop.permute.xlu1 %155 }
  0x8b   :  { %v151_v42 = vpop.permute.xlu0 %150 }
  0x8d   :  { %v166_v45 = vpop.permute.xlu1 %165 }
  0x8f   :  { %v161_v44 = vpop.permute.xlu0 %160 }
  0x91   :  { %v176_v54 = vpop.permute.xlu1 %175 }
  0x93   :  { %v171_v49 = vpop.permute.xlu0 %170 }
  0x95   :  { %v186_v2 = vpop.permute.xlu1 %185 }
  0x97   :  { %v181_v61 = vpop.permute.xlu0 %180 }
  0x9b   :  { %v303_v15 = vpop.permute.xlu0 %302 }
  0xdf   :  { %v385_v22 = vpop.f32.mrb[0].mxu0 }
  0xe0   :  { %v120_v23 = vadd.f32 %v385_v22, %v50_v20  ;;  %v111_v24 = vpop.f32.mrb[1].mxu0 }
  0xe1   :  { %v112_v26 = vadd.f32 %v111_v24, %v40_v21  ;;  %v386_v27 = vpop.f32.mrb[2].mxu0 }
  0xe2   :  { %v123_v29 = vadd.f32 %v386_v27, %v55_v25  ;;  %v114_v30 = vpop.f32.mrb[3].mxu0  ;;  %v128_v32 = vmax.f32 %v120_v23, 0.0 }
  0xe3   :  { %v115_v31 = vadd.f32 %v114_v30, %v45_v28  ;;  %v126_v34 = vmax.f32 %v112_v26, 0.0 }
  0xe4   :  { %v129_v33 = vmax.f32 %v123_v29, 0.0 }
  0xe5   :  { %v127_v35 = vmax.f32 %v115_v31, 0.0 }
  0xe6   :  { %v131_v36 = vpack.c.bf16 %v129_v33, %v128_v32 }
  0xe7   :  { %v130_v37 = vpack.c.bf16 %v127_v35, %v126_v34 }
  0xe9   :  { %387 = vmatprep.subr.bf16.mxu1 %v130_v37 }
  0xea   :  { %388 = vmatpush3.bf16.msra.mxu1 %v130_v37 }
  0xeb   :  { %389 = vmatprep.subr.bf16.mxu1 %v131_v36 }
  0xee   :  { %390 = vmatpush3.bf16.msra.mxu1 %v131_v36 }
  0xf1   :  { %392 = vmatmul.mubr.msk.bf16.vlgmr.msra.gmra.mrb[0].mxu1 %vm208_vm1, %v420_v38 }
  0xf2   :  { %395 = vmatprep.mubr.msk.bf16.mxu1 %vm208_vm1, %v421_v39 }
  0xf9   :  { %396 = vmatmul.mubr.msk.bf16.gmra.mrb[4].mxu1 %vm208_vm1, %v422_v40 }
 0x1c4   :  { %v393_v46 = vpop.f32.mrb[0].mxu1 }
 0x1c5   :  { %v264_v47 = vadd.f32 %v393_v46, %v161_v44  ;;  %v255_v48 = vpop.f32.mrb[1].mxu1 }
 0x1c6   :  { %v256_v50 = vadd.f32 %v255_v48, %v151_v42  ;;  %v394_v51 = vpop.f32.mrb[2].mxu1 }
 0x1c7   :  { %v267_v52 = vadd.f32 %v394_v51, %v166_v45  ;;  %v258_v53 = vpop.f32.mrb[3].mxu1  ;;  %v288_v56 = vmax.f32 %v264_v47, 0.0 }
 0x1c8   :  { %v259_v55 = vadd.f32 %v258_v53, %v156_v43  ;;  %v286_v58 = vmax.f32 %v256_v50, 0.0 }
 0x1c9   :  { %v289_v57 = vmax.f32 %v267_v52, 0.0 }
 0x1ca   :  { %v287_v59 = vmax.f32 %v259_v55, 0.0 }
 0x1cb   :  { %v295_v60 = vpack.c.bf16 %v289_v57, %v288_v56 }
 0x1cc   :  { %v294_v62 = vpack.c.bf16 %v287_v59, %v286_v58  ;;  %v397_v63 = vpop.f32.mrb[4].mxu1 }
 0x1cd   :  { %v280_v0 = vadd.f32 %v397_v63, %v181_v61  ;;  %v271_v1 = vpop.f32.mrb[5].mxu1 }
 0x1ce   :  { %v272_v3 = vadd.f32 %v271_v1, %v171_v49  ;;  %v398_v4 = vpop.f32.mrb[6].mxu1  ;;  %400 = vmatpush3.bf16.msra.mxu0 %v294_v62 }
 0x1cf   :  { %v283_v5 = vadd.f32 %v398_v4, %v186_v2  ;;  %v274_v6 = vpop.f32.mrb[7].mxu1  ;;  %401 = vmatprep.subr.bf16.mxu0 %v424_v41  ;;  %v292_v8 = vmax.f32 %v280_v0, 0.0 }
 0x1d0   :  { %v275_v7 = vadd.f32 %v274_v6, %v176_v54  ;;  %v290_v10 = vmax.f32 %v272_v3, 0.0 }
 0x1d1   :  { %v293_v9 = vmax.f32 %v283_v5, 0.0 }
 0x1d2   :  { %v291_v11 = vmax.f32 %v275_v7, 0.0  ;;  %402 = vmatpush3.bf16.msra.mxu0 %v295_v60 }
 0x1d3   :  { %v297_v12 = vpack.c.bf16 %v293_v9, %v292_v8  ;;  %403 = vmatprep.subr.bf16.mxu0 %v424_v41 }
 0x1d4   :  { %v296_v13 = vpack.c.bf16 %v291_v11, %v290_v10 }
 0x1d6   :  { %404 = vmatpush3.bf16.msra.mxu0 %v296_v13 }
 0x1d7   :  { %405 = vmatprep.subr.bf16.mxu0 %v424_v41 }
 0x1da   :  { %406 = vmatpush3.bf16.msra.mxu0 %v297_v12 }
 0x1dd   :  { %408 = vmatmul.mubr.msk.bf16.vlgmr.msra.gmra.mrb[4].mxu0 %vm305_vm3, %v298_v14 }
 0x2b0   :  { %v343_v16 = vpop.f32.mrb[4].mxu0 }
 0x2b1   :  { %v344_v17 = vadd.f32 %v343_v16, %v303_v15  ;;  %v409_v18 = vpop.f32.mrb[5].mxu0 }
 0x2b2   :  { %v346_v19 = vpop.f32.mrb[6].mxu0 }
 0x2b3   :  { %349 = vst.msk [vmem:[%s548_s7] sm:$0xff] %vm67_vm0, %v344_v17  ;;  %v410_v20 = vpop.f32.mrb[7].mxu0 }

</bundles_post_ra>
